<compile_context>
chip_gen: v7x
topology: tpu7x:2x2x1
jax: 0.10.0
libtpu: 0.0.40
codegen_flags: <defaults>
</compile_context>

<pallas_src>
import functools
import math

import jax
import jax.numpy as jnp
from jax import lax
from jax.experimental import pallas as pl
from jax.experimental.pallas import tpu as pltpu

_LOG_LO = math.log(1e-10)   # torch.clamp(vol, 1e-10, 10000.0) done in log space
_LOG_HI = math.log(10000.0)


def _softbox_kernel(ids_ref, table_ref, pos_ref):
    # Per-grid-step shapes:
    #   ids_ref   : (2, TB)     int32  -- row 0 = box1 ids, row 1 = box2 ids
    #   table_ref : (2D+1, V)   f32    -- rows [0:D)   = min_embedding.T
    #                                     rows [D:2D)  = exp(delta_embedding).T
    #                                     row  [2D]    = clipped log-volume per box
    #   pos_ref   : (1, TB)     f32    -- conditional probability P(box1 | box2)
    d = (table_ref.shape[0] - 1) // 2
    v = table_ref.shape[1]
    tb = ids_ref.shape[1]

    ids = ids_ref[...]                                    # (2, TB) int32
    iota_v = lax.broadcasted_iota(jnp.int32, (v, tb), 0)  # (V, TB)

    # Fused gather: two one-hot (V, TB) matmuls against the stacked table
    # deliver min, exp(delta) and the precomputed log-volume with the embed
    # dim in sublanes and batch in lanes.
    # TODO(synk): for vocab beyond a few hundred entries replace the one-hot
    # matmul with a scalar-prefetch DMA row gather (ids in SMEM driving a
    # pl.Element index_map / make_async_copy), and single-buffer the resident
    # table (pipeline_mode=pl.Buffered(1)) against v7x's 64 MiB VMEM.
    oh1 = (iota_v == ids[0:1, :]).astype(jnp.float32)     # (V, TB)
    oh2 = (iota_v == ids[1:2, :]).astype(jnp.float32)     # (V, TB)

    table = table_ref[...]                                # (2D+1, V)
    g1 = jnp.dot(table, oh1, preferred_element_type=jnp.float32)   # (2D+1, TB)
    g2 = jnp.dot(table, oh2, preferred_element_type=jnp.float32)   # (2D+1, TB)

    min1, w1 = g1[0:d, :], g1[d:2 * d, :]                 # (D, TB)
    min2, w2 = g2[0:d, :], g2[d:2 * d, :]                 # (D, TB)
    log_b = g2[2 * d:2 * d + 1, :]                        # (1, TB), pre-clipped

    # Intersection box; max1/max2 are never materialized (vreg pressure).
    inter_min = jnp.maximum(min1, min2)
    inter_max = jnp.minimum(min1 + w1, min2 + w2)

    # volumes(box) = prod_d softplus(side), evaluated in log space so the
    # product over the embedding (sublane) axis is a supported sum-reduction.
    log_vol_inter = jnp.sum(
        jnp.log(jax.nn.softplus(inter_max - inter_min)), axis=0, keepdims=True)

    # log(clamp(vol, 1e-10, 1e4)) == clip(log(vol), log(1e-10), log(1e4))
    log_i = jnp.clip(log_vol_inter, _LOG_LO, _LOG_HI)     # (1, TB)

    pos_ref[...] = jnp.exp(log_i - log_b)                 # lane-dense store


def _pick_batch_tile(batch, max_tile):
    # Lane-dense tiles (multiples of 128); keep grid >= 2 whenever possible so
    # ("parallel",) shards across both TensorCores on v7x.  Small / ragged
    # batches fall back to a single full-array block.
    if batch < 256 or batch % 128 != 0:
        return batch
    for tile in (4096, 2048, 1024, 512, 256, 128):
        if tile <= max_tile and batch % tile == 0 and batch // tile >= 2:
            return tile
    return 128


@functools.partial(jax.jit, static_argnames=("max_batch_tile",))
def softbox_forward(min_embedding, delta_embedding, ids, *, max_batch_tile=2048):
    """ids: (B, 2) integer indices into the box-embedding tables."""
    vocab, d = min_embedding.shape
    batch = ids.shape[0]
    tb = _pick_batch_tile(batch, max_batch_tile)

    # One-time layout plumbing + precompute (tiny XLA ops on the (V, D) table):
    #   * exp(delta) is gathered directly instead of delta  -> no in-kernel exp
    #   * box2's clipped log-volume is precomputed per vocab entry and gathered
    #     with the same one-hot matmul                      -> no in-kernel
    #     softplus/log/sublane-reduce for box2.
    ids_t = ids.astype(jnp.int32).T                               # (2, B)
    min_t = min_embedding.astype(jnp.float32).T                   # (D, V)
    exp_dlt = jnp.exp(delta_embedding.astype(jnp.float32))        # (V, D)
    log_vol = jnp.sum(jnp.log(jax.nn.softplus(exp_dlt)), axis=1)  # (V,)
    log_vol = jnp.clip(log_vol, _LOG_LO, _LOG_HI)[None, :]        # (1, V)
    table = jnp.concatenate([min_t, exp_dlt.T, log_vol], axis=0)  # (2D+1, V)

    pos = pl.pallas_call(
        _softbox_kernel,
        out_shape=jax.ShapeDtypeStruct((1, batch), jnp.float32),
        grid_spec=pltpu.PrefetchScalarGridSpec(
            num_scalar_prefetch=0,
            grid=(batch // tb,),
            in_specs=[
                pl.BlockSpec((2, tb), lambda i: (0, i)),            # ids
                pl.BlockSpec((2 * d + 1, vocab), lambda i: (0, 0)),  # table
            ],
            out_specs=pl.BlockSpec((1, tb), lambda i: (0, i)),
        ),
        compiler_params=pltpu.CompilerParams(
            dimension_semantics=("parallel",)),
    )(ids_t, table)

    pos = pos[0]                                            # (B,)
    # neg = 1 - pos and the final stack are trivial XLA elementwise ops.
    return jnp.stack([pos, 1.0 - pos], axis=1)              # (B, 2)


def softbox_reference(min_embedding, delta_embedding, ids):
    """Pure-JAX reference mirroring the PyTorch module."""
    min_rep = min_embedding[ids]
    dlt_rep = delta_embedding[ids]
    max_rep = min_rep + jnp.exp(dlt_rep)
    min1, max1 = min_rep[:, 0, :], max_rep[:, 0, :]
    min2, max2 = min_rep[:, 1, :], max_rep[:, 1, :]

    def vol(lo, hi):
        return jnp.prod(jax.nn.softplus(hi - lo), axis=1)

    inter_lo = jnp.maximum(min1, min2)
    inter_hi = jnp.minimum(max1, max2)
    log_i = jnp.log(jnp.clip(vol(inter_lo, inter_hi), 1e-10, 10000.0))
    log_b = jnp.log(jnp.clip(vol(min2, max2), 1e-10, 10000.0))
    pos = jnp.exp(log_i - log_b)
    return jnp.stack([pos, 1.0 - pos], axis=1)


if __name__ == "__main__":
    # SoftBox.__init__(vocab_size, embed_dim, num_class, min_init_value, delta_init_value)
    vocab_size, embed_dim = 16, 32
    min_init_value = (1e-4, 0.9)
    delta_init_value = (-0.1, -0.001)

    key = jax.random.PRNGKey(0)
    k_min, k_dlt, k_ids = jax.random.split(key, 3)

    # deterministic "uniform.Uniform(lo, hi).sample((vocab, dim))" equivalents
    min_embedding = jax.random.uniform(
        k_min, (vocab_size, embed_dim), jnp.float32,
        minval=min_init_value[0], maxval=min_init_value[1])
    delta_embedding = jax.random.uniform(
        k_dlt, (vocab_size, embed_dim), jnp.float32,
        minval=delta_init_value[0], maxval=delta_init_value[1])

    # Lane-dense multi-tile path (batch multiple of 128, grid length 2).
    batch = 256
    ids = jax.random.randint(k_ids, (batch, 2), 0, vocab_size, dtype=jnp.int32)
    pred = jax.block_until_ready(softbox_forward(min_embedding, delta_embedding, ids))
    ref = softbox_reference(min_embedding, delta_embedding, ids)
    assert pred.shape == (batch, 2)
    assert jnp.allclose(pred, ref, atol=1e-4, rtol=1e-5), (pred, ref)

    # Small-batch fallback path (single full-array block).
    ids_small = ids[:8]
    pred_s = jax.block_until_ready(
        softbox_forward(min_embedding, delta_embedding, ids_small))
    ref_s = softbox_reference(min_embedding, delta_embedding, ids_small)
    assert pred_s.shape == (8, 2)
    assert jnp.allclose(pred_s, ref_s, atol=1e-4, rtol=1e-5), (pred_s, ref_s)

    print("KERNEL_OK")
</pallas_src>

<mosaic_0001>
module attributes {stable_mosaic.version = 11 : i64} {
  func.func @_softbox_kernel(%arg0: i32, %arg1: memref<2x128xi32, #tpu.memory_space<vmem>>, %arg2: memref<65x16xf32, #tpu.memory_space<vmem>>, %arg3: memref<1x128xf32, #tpu.memory_space<vmem>>) attributes {dimension_semantics = [#tpu.dimension_semantics<parallel>], iteration_bounds = array<i64: 2>, scalar_prefetch = 0 : i64, scratch_operands = 0 : i64, tpu.core_type = #tpu.core_type<tc>, window_params = [{transform_indices = @transform_0, window_bounds = array<i64: 2, 128>}, {pipeline_mode = #tpu.pipeline_mode<synchronous>, transform_indices = @transform_1, window_bounds = array<i64: 65, 16>}, {transform_indices = @transform_2, window_bounds = array<i64: 1, 128>}]} {
    %c0 = arith.constant 0 : index
    %c0_0 = arith.constant 0 : index
    %0 = vector.load %arg1[%c0, %c0_0] : memref<2x128xi32, #tpu.memory_space<vmem>>, vector<2x128xi32>
    %1 = tpu.iota {dimensions = array<i32: 0>} : vector<16x128xi32>
    %2 = vector.extract_strided_slice %0 {offsets = [0, 0], sizes = [1, 128], strides = [1, 1]} : vector<2x128xi32> to vector<1x128xi32>
    %3 = vector.broadcast %2 : vector<1x128xi32> to vector<16x128xi32>
    %4 = arith.cmpi eq, %1, %3 : vector<16x128xi32>
    %5 = arith.extui %4 : vector<16x128xi1> to vector<16x128xi32>
    %6 = arith.sitofp %5 : vector<16x128xi32> to vector<16x128xf32>
    %7 = vector.extract_strided_slice %0 {offsets = [1, 0], sizes = [1, 128], strides = [1, 1]} : vector<2x128xi32> to vector<1x128xi32>
    %8 = vector.broadcast %7 : vector<1x128xi32> to vector<16x128xi32>
    %9 = arith.cmpi eq, %1, %8 : vector<16x128xi32>
    %10 = arith.extui %9 : vector<16x128xi1> to vector<16x128xi32>
    %11 = arith.sitofp %10 : vector<16x128xi32> to vector<16x128xf32>
    %c0_1 = arith.constant 0 : index
    %c0_2 = arith.constant 0 : index
    %12 = vector.load %arg2[%c0_1, %c0_2] : memref<65x16xf32, #tpu.memory_space<vmem>>, vector<65x16xf32>
    %cst = arith.constant dense<0.000000e+00> : vector<65x128xf32>
    %13 = tpu.matmul %12, %6, %cst {dimension_numbers = #tpu.dot_dimension_numbers<[1], [0], [0], [1], [0, 0, 1, 1], [], []>} : vector<65x16xf32>, vector<16x128xf32>, vector<65x128xf32> -> vector<65x128xf32>
    %cst_3 = arith.constant dense<0.000000e+00> : vector<65x128xf32>
    %14 = tpu.matmul %12, %11, %cst_3 {dimension_numbers = #tpu.dot_dimension_numbers<[1], [0], [0], [1], [0, 0, 1, 1], [], []>} : vector<65x16xf32>, vector<16x128xf32>, vector<65x128xf32> -> vector<65x128xf32>
    %15 = vector.extract_strided_slice %13 {offsets = [0, 0], sizes = [32, 128], strides = [1, 1]} : vector<65x128xf32> to vector<32x128xf32>
    %16 = vector.extract_strided_slice %13 {offsets = [32, 0], sizes = [32, 128], strides = [1, 1]} : vector<65x128xf32> to vector<32x128xf32>
    %17 = vector.extract_strided_slice %14 {offsets = [0, 0], sizes = [32, 128], strides = [1, 1]} : vector<65x128xf32> to vector<32x128xf32>
    %18 = vector.extract_strided_slice %14 {offsets = [32, 0], sizes = [32, 128], strides = [1, 1]} : vector<65x128xf32> to vector<32x128xf32>
    %19 = vector.extract_strided_slice %14 {offsets = [64, 0], sizes = [1, 128], strides = [1, 1]} : vector<65x128xf32> to vector<1x128xf32>
    %20 = arith.maximumf %15, %17 : vector<32x128xf32>
    %21 = arith.addf %15, %16 : vector<32x128xf32>
    %22 = arith.addf %17, %18 : vector<32x128xf32>
    %23 = arith.minimumf %21, %22 : vector<32x128xf32>
    %24 = arith.subf %23, %20 : vector<32x128xf32>
    %cst_4 = arith.constant 0.000000e+00 : f32
    %25 = vector.broadcast %cst_4 : f32 to vector<32x128xf32>
    %26 = arith.maximumf %24, %25 : vector<32x128xf32>
    %27 = vector.broadcast %cst_4 : f32 to vector<32x128xf32>
    %28 = arith.subf %24, %27 : vector<32x128xf32>
    %29 = arith.cmpf one, %28, %28 : vector<32x128xf32>
    %30 = vector.broadcast %cst_4 : f32 to vector<32x128xf32>
    %31 = arith.addf %24, %30 : vector<32x128xf32>
    %32 = math.absf %28 : vector<32x128xf32>
    %cst_5 = arith.constant 0.000000e+00 : f32
    %33 = vector.broadcast %cst_5 : f32 to vector<32x128xf32>
    %34 = arith.subf %33, %32 : vector<32x128xf32>
    %35 = math.exp %34 : vector<32x128xf32>
    %36 = math.log1p %35 : vector<32x128xf32>
    %37 = arith.addf %26, %36 : vector<32x128xf32>
    %38 = arith.select %29, %31, %37 : vector<32x128xi1>, vector<32x128xf32>
    %39 = math.log %38 : vector<32x128xf32>
    %cst_6 = arith.constant dense<0.000000e+00> : vector<128xf32>
    %40 = vector.multi_reduction <add>, %39, %cst_6 [0] : vector<32x128xf32> to vector<128xf32>
    %41 = vector.shape_cast %40 : vector<128xf32> to vector<1x128xf32>
    %cst_7 = arith.constant -23.0258503 : f32
    %cst_8 = arith.constant 9.21034049 : f32
    %42 = vector.broadcast %cst_7 : f32 to vector<1x128xf32>
    %43 = arith.maximumf %42, %41 : vector<1x128xf32>
    %44 = vector.broadcast %cst_8 : f32 to vector<1x128xf32>
    %45 = arith.minimumf %44, %43 : vector<1x128xf32>
    %46 = arith.subf %45, %19 : vector<1x128xf32>
    %47 = math.exp %46 : vector<1x128xf32>
    %c0_9 = arith.constant 0 : index
    %c0_10 = arith.constant 0 : index
    %48 = vector.load %arg3[%c0_9, %c0_10] : memref<1x128xf32, #tpu.memory_space<vmem>>, vector<1x128xf32>
    tpu.vector_store %arg3[%c0_9, %c0_10], %47 {strides = array<i32>} : memref<1x128xf32, #tpu.memory_space<vmem>>, vector<1x128xf32>,
    return
  }
  func.func @transform_0(%arg0: i32) -> (i32, i32) {
    %c0_i32 = arith.constant 0 : i32
    %c0_i32_0 = arith.constant 0 : i32
    return %c0_i32, %arg0 : i32, i32
  }
  func.func @transform_1(%arg0: i32) -> (i32, i32) {
    %c0_i32 = arith.constant 0 : i32
    %c0_i32_0 = arith.constant 0 : i32
    %c0_i32_1 = arith.constant 0 : i32
    return %c0_i32, %c0_i32_0 : i32, i32
  }
  func.func @transform_2(%arg0: i32) -> (i32, i32) {
    %c0_i32 = arith.constant 0 : i32
    %c0_i32_0 = arith.constant 0 : i32
    return %c0_i32, %arg0 : i32, i32
  }
}

</mosaic_0001>

<bundles_post_ra>
// kernel: softbox_forward.1
= control target key start
LH: loop header
LB: loop body
LE: loop exit
PB: predicated region body
PF: predicated region fallthrough
CT: control target
= control target key end

     0   :  { %s768_s9 = smov 0   ;;  %s883_s0 = inlined_call_operand.vmem [shape: s32[2,256], index: 0, kind: input, shape index: {}]   ;;  %s884_s1 = inlined_call_operand.vmem [shape: f32[65,16], index: 1, kind: input, shape index: {}]   ;;  %s885_s2 = inlined_call_operand.vmem [shape: f32[1,256], index: 2, kind: output, shape index: {}]  }
   0x1 LB: > { %s579_s10 = sadd.s32 4294967295, %s747_s9   ;;  %p583_p0 = scmp.ge.s32.totalorder %s747_s9, 1  ;;  %s747_s9 = sphi %s768_s9, %s12_s9  }
   0x2   : > { %p111_p1 = scmp.lt.s32.totalorder %s747_s9, 3 }
   0x4   : > { %p112_p2 = pnand %p583_p0, %p111_p1 }
   0x5   : > { %p130_p3 = scmp.lt.s32.totalorder (!%p112_p2), %s579_s10, 1  ;;  %v138_v0 = vlaneseq (!%p112_p2)  ;;  %v749_v1 = vmov (!%p112_p2), 0.0|0.0   ;;  %vm750_vm0 = vmmov (!%p112_p2), 0   ;;  %v751_v3 = vmov (!%p112_p2), 0.0   ;;  %v161_v11 = vld [vmem:[%s884_s1] sm:$0xff] (!%p112_p2)  ;;  %v162_v12 = vld [vmem:[%s884_s1 + $0x8] sm:$0xff] (!%p112_p2) }
   0x6   : > { %115 = sbr.rel (%p112_p2) target bundleno = 354 (0x162), region = 28  ;;  %697 = vmatprep.subr.bf16.mxu0 (!%p112_p2), %v749_v1  ;;  %700 = vmatprep.subr.bf16.mxu1 (!%p112_p2), %v749_v1  ;;  %v752_v10 = vmov (!%p112_p2), 1.0|1.0   ;;  %vm170_vm7 = vcmask (!%p112_p2), 130048   ;;  %v163_v13 = vld [vmem:[%s884_s1 + $0x10] sm:$0xff] (!%p112_p2)  ;;  %v164_v14 = vld [vmem:[%s884_s1 + $0x18] sm:$0xff] (!%p112_p2) }
   0x7   : > { %v139_v2 = vshrl.u32 (!%p112_p2), %v138_v0, 7  ;;  %639 = vmatprep.mubr.msk.f32.mxu0 (!%p112_p2), %vm750_vm0, %v751_v3  ;;  %670 = vmatprep.mubr.msk.f32.mxu1 (!%p112_p2), %vm750_vm0, %v751_v3  ;;  %v165_v15 = vld [vmem:[%s884_s1 + $0x20] sm:$0xff] (!%p112_p2)  ;;  %v166_v16 = vld [vmem:[%s884_s1 + $0x28] sm:$0xff] (!%p112_p2)  ;;  %v167_v17 = vld [vmem:[%s884_s1 + $0x30] sm:$0xff] (!%p112_p2) }
   0x8   : > { %v168_v18 = vld [vmem:[%s884_s1 + $0x38] sm:$0xff] (!%p112_p2)  ;;  %v169_v19 = vld [vmem:[%s884_s1 + $0x40] sm:$0x1] (!%p112_p2) }
   0x9   : > { %v143_v4 = vsub.s32 (!%p112_p2), 0, %v139_v2  ;;  %v153_v5 = vsub.s32 (!%p112_p2), 1, %v139_v2  ;;  %v140_v6 = vadd.s32 (!%p112_p2), 8, %v139_v2 }
   0xd   : > { %s887_s10 = smov (!%p130_p3, %s579_s10), 1 }
   0xe   : > { %s584_s11 = sshll.u32 %s887_s10, 1  ;;  %s136_s7 = scalar_lea.vmem %s885_s2, %s887_s10 }
   0xf   : > { %s133_s14 = scalar_lea.vmem %s883_s0, %s584_s11 }
  0x10   : > { %v137_v7 = vld [vmem:[%s133_s14] sm:$0x3] }
  0x11   : > { %v144_v8 = vrot.slane %v137_v7, %v143_v4  ;;  %v154_v9 = vrot.slane %v137_v7, %v153_v5 }
  0x13   : > { %vm145_vm1 = vcmp.eq.s32.totalorder %v139_v2, %v144_v8  ;;  %vm146_vm2 = vcmp.eq.s32.totalorder %v140_v6, %v144_v8  ;;  %vm155_vm3 = vcmp.eq.s32.totalorder %v139_v2, %v154_v9  ;;  %vm156_vm4 = vcmp.eq.s32.totalorder %v140_v6, %v154_v9 }
  0x14   : > { %vm698_vm5 = vmpackc.low %vm146_vm2, %vm145_vm1 }
  0x15   : > { %699 = vmatpush3.bf16.msk.msra.mxu0 %vm698_vm5, %v752_v10  ;;  %vm701_vm6 = vmpackc.low %vm156_vm4, %vm155_vm3 }
  0x16   : > { %702 = vmatpush3.bf16.msk.msra.mxu1 %vm701_vm6, %v752_v10 }
  0x18   : > { %640 = vmatmul.mubr.msk.f32.vlgmr.msra.gmra.mrb[0].mxu0 %vm170_vm7, %v161_v11 }
  0x19   : > { %671 = vmatmul.mubr.msk.f32.vlgmr.msra.gmra.mrb[0].mxu1 %vm170_vm7, %v161_v11  ;;  %642 = vmatprep.mubr.msk.f32.mxu0 %vm750_vm0, %v751_v3 }
  0x1a   : > { %673 = vmatprep.mubr.msk.f32.mxu1 %vm750_vm0, %v751_v3 }
  0x1c   : > { %643 = vmatmul.mubr.msk.f32.gmra.mrb[2].mxu0 %vm170_vm7, %v162_v12 }
  0x1d   : > { %674 = vmatmul.mubr.msk.f32.gmra.mrb[2].mxu1 %vm170_vm7, %v162_v12  ;;  %645 = vmatprep.mubr.msk.f32.mxu0 %vm750_vm0, %v751_v3 }
  0x1e   : > { %676 = vmatprep.mubr.msk.f32.mxu1 %vm750_vm0, %v751_v3 }
  0x20   : > { %646 = vmatmul.mubr.msk.f32.gmra.mrb[4].mxu0 %vm170_vm7, %v163_v13 }
  0x21   : > { %677 = vmatmul.mubr.msk.f32.gmra.mrb[4].mxu1 %vm170_vm7, %v163_v13  ;;  %648 = vmatprep.mubr.msk.f32.mxu0 %vm750_vm0, %v751_v3 }
  0x22   : > { %679 = vmatprep.mubr.msk.f32.mxu1 %vm750_vm0, %v751_v3 }
  0x24   : > { %649 = vmatmul.mubr.msk.f32.gmra.mrb[6].mxu0 %vm170_vm7, %v164_v14 }
  0x25   : > { %680 = vmatmul.mubr.msk.f32.gmra.mrb[6].mxu1 %vm170_vm7, %v164_v14  ;;  %651 = vmatprep.mubr.msk.f32.mxu0 %vm750_vm0, %v751_v3 }
  0x26   : > { %682 = vmatprep.mubr.msk.f32.mxu1 %vm750_vm0, %v751_v3 }
  0x28   : > { %652 = vmatmul.mubr.msk.f32.gmra.mrb[8].mxu0 %vm170_vm7, %v165_v15 }
  0x29   : > { %683 = vmatmul.mubr.msk.f32.gmra.mrb[8].mxu1 %vm170_vm7, %v165_v15  ;;  %654 = vmatprep.mubr.msk.f32.mxu0 %vm750_vm0, %v751_v3 }
  0x2a   : > { %685 = vmatprep.mubr.msk.f32.mxu1 %vm750_vm0, %v751_v3 }
  0x2c   : > { %655 = vmatmul.mubr.msk.f32.gmra.mrb[10].mxu0 %vm170_vm7, %v166_v16 }
  0x2d   : > { %686 = vmatmul.mubr.msk.f32.gmra.mrb[10].mxu1 %vm170_vm7, %v166_v16  ;;  %657 = vmatprep.mubr.msk.f32.mxu0 %vm750_vm0, %v751_v3 }
  0x2e   : > { %688 = vmatprep.mubr.msk.f32.mxu1 %vm750_vm0, %v751_v3 }
  0x30   : > { %658 = vmatmul.mubr.msk.f32.gmra.mrb[12].mxu0 %vm170_vm7, %v167_v17 }
  0x31   : > { %689 = vmatmul.mubr.msk.f32.gmra.mrb[12].mxu1 %vm170_vm7, %v167_v17  ;;  %660 = vmatprep.mubr.msk.f32.mxu0 %vm750_vm0, %v751_v3 }
  0x32   : > { %691 = vmatprep.mubr.msk.f32.mxu1 %vm750_vm0, %v751_v3 }
  0x34   : > { %661 = vmatmul.mubr.msk.f32.gmra.mrb[14].mxu0 %vm170_vm7, %v168_v18 }
  0x35   : > { %692 = vmatmul.mubr.msk.f32.gmra.mrb[14].mxu1 %vm170_vm7, %v168_v18  ;;  %663 = vmatprep.mubr.msk.f32.mxu0 %vm750_vm0, %v751_v3 }
  0x36   : > { %694 = vmatprep.mubr.msk.f32.mxu1 %vm750_vm0, %v751_v3 }
  0x38   : > { %664 = vmatmul.mubr.msk.f32.gmra.mrb[16].mxu0 %vm170_vm7, %v169_v19 }
  0x39   : > { %695 = vmatmul.mubr.msk.f32.gmra.mrb[16].mxu1 %vm170_vm7, %v169_v19 }
  0xeb   : > { %v264_v20 = vpop.f32.mrb[0].mxu0 }
  0xec   : > { %v373_v21 = vpop.f32.mrb[0].mxu1  ;;  %v641_v22 = vpop.f32.mrb[1].mxu0 }
  0xed   : > { %v417_v23 = vmax.f32 %v264_v20, %v373_v21  ;;  %v672_v24 = vpop.f32.mrb[1].mxu1 }
  0xef   : > { %v269_v25 = vpop.f32.mrb[2].mxu0 }
  0xf0   : > { %v378_v26 = vpop.f32.mrb[2].mxu1  ;;  %v644_v27 = vpop.f32.mrb[3].mxu0 }
  0xf1   : > { %v418_v28 = vmax.f32 %v269_v25, %v378_v26  ;;  %v675_v29 = vpop.f32.mrb[3].mxu1 }
  0xf3   : > { %v274_v30 = vpop.f32.mrb[4].mxu0 }
  0xf4   : > { %v383_v31 = vpop.f32.mrb[4].mxu1  ;;  %v647_v32 = vpop.f32.mrb[5].mxu0 }
  0xf5   : > { %v419_v33 = vmax.f32 %v274_v30, %v383_v31  ;;  %v678_v34 = vpop.f32.mrb[5].mxu1 }
  0xf7   : > { %v279_v35 = vpop.f32.mrb[6].mxu0 }
  0xf8   : > { %v388_v36 = vpop.f32.mrb[6].mxu1  ;;  %v650_v37 = vpop.f32.mrb[7].mxu0 }
  0xf9   : > { %v420_v38 = vmax.f32 %v279_v35, %v388_v36  ;;  %v681_v39 = vpop.f32.mrb[7].mxu1 }
  0xfb   : > { %v284_v40 = vpop.f32.mrb[8].mxu0 }
  0xfc   : > { %v421_v41 = vadd.f32 %v284_v40, %v264_v20  ;;  %v393_v42 = vpop.f32.mrb[8].mxu1  ;;  %v653_v43 = vpop.f32.mrb[9].mxu0 }
  0xfd   : > { %v425_v44 = vadd.f32 %v393_v42, %v373_v21  ;;  %v684_v45 = vpop.f32.mrb[9].mxu1 }
  0xff   : > { %v429_v46 = vmin.f32 %v421_v41, %v425_v44  ;;  %v289_v47 = vpop.f32.mrb[10].mxu0 }
 0x100   : > { %v422_v48 = vadd.f32 %v289_v47, %v269_v25  ;;  %v398_v49 = vpop.f32.mrb[10].mxu1  ;;  %v656_v50 = vpop.f32.mrb[11].mxu0 }
 0x101   : > { %v845_v51 = vsub.f32 %v429_v46, %v417_v23  ;;  %v426_v52 = vadd.f32 %v398_v49, %v378_v26  ;;  %v687_v53 = vpop.f32.mrb[11].mxu1 }
 0x103   : > { %v449_v54 = vand.u32 2147483647, %v845_v51  ;;  %v430_v55 = vmin.f32 %v422_v48, %v426_v52  ;;  %v294_v56 = vpop.f32.mrb[12].mxu0  ;;  %v437_v37 = vmax.f32 %v845_v51, 0.0  ;;  %vm441_vm9 = vcmp.ne.f32.partialorder %v845_v51, %v845_v51 }
 0x104   : > { %v423_v57 = vadd.f32 %v294_v56, %v274_v30  ;;  %v403_v58 = vpop.f32.mrb[12].mxu1  ;;  %v659_v59 = vpop.f32.mrb[13].mxu0 }
 0x105   : > { %v453_v60 = vsub.f32 0.0, %v449_v54  ;;  %v848_v61 = vsub.f32 %v430_v55, %v418_v28  ;;  %v427_v62 = vadd.f32 %v403_v58, %v383_v31  ;;  %v690_v63 = vpop.f32.mrb[13].mxu1 }
 0x107   : > { %v457_v0 = vmul.f32 1.442695, %v453_v60  ;;  %v450_v1 = vand.u32 2147483647, %v848_v61  ;;  %v299_v2 = vpop.f32.mrb[14].mxu0  ;;  %v431_v3 = vmin.f32 %v423_v57, %v427_v62  ;;  %v438_v50 = vmax.f32 %v848_v61, 0.0 }
 0x108   : > { %v424_v4 = vadd.f32 %v299_v2, %v279_v35  ;;  %v408_v5 = vpop.f32.mrb[14].mxu1  ;;  %v662_v6 = vpop.f32.mrb[15].mxu0  ;;  %vm442_vm11 = vcmp.ne.f32.partialorder %v848_v61, %v848_v61 }
 0x109   : > { %715 = vpow2.f32 %v457_v0  ;;  %v454_v7 = vsub.f32 0.0, %v450_v1  ;;  %v428_v8 = vadd.f32 %v408_v5, %v388_v36  ;;  %v693_v9 = vpop.f32.mrb[15].mxu1  ;;  %v851_v10 = vsub.f32 %v431_v3, %v419_v33 }
 0x10b   : > { %v459_v11 = vmul.f32 1.442695, %v454_v7  ;;  %v432_v12 = vmin.f32 %v424_v4, %v428_v8  ;;  %v304_v13 = vpop.f32.mrb[16].mxu0  ;;  %v451_v14 = vand.u32 2147483647, %v851_v10  ;;  %vm443_vm13 = vcmp.ne.f32.partialorder %v851_v10, %v851_v10 }
 0x10c   : > { %v854_v15 = vpop.f32.mrb[16].mxu1  ;;  %v665_v16 = vpop.f32.mrb[17].mxu0 }
 0x10d   : > { %717 = vpow2.f32 %v459_v11  ;;  %v856_v17 = vsub.f32 %v432_v12, %v420_v38  ;;  %v696_v18 = vpop.f32.mrb[17].mxu1  ;;  %v455_v19 = vsub.f32 0.0, %v451_v14 }
 0x10f   : > { %v452_v20 = vand.u32 2147483647, %v856_v17  ;;  %v461_v21 = vmul.f32 1.442695, %v455_v19  ;;  %v440_v4 = vmax.f32 %v856_v17, 0.0  ;;  %vm444_vm15 = vcmp.ne.f32.partialorder %v856_v17, %v856_v17 }
 0x111   : > { %v456_v22 = vsub.f32 0.0, %v452_v20  ;;  %719 = vpow2.f32 %v461_v21 }
 0x113   : > { %v716_v23 = vpop.eup %715  ;;  %v463_v24 = vmul.f32 1.442695, %v456_v22 }
 0x114   : > { %v465_v25 = vadd.f32 1.0, %v716_v23  ;;  %v468_v28 = vmul.f32 -0.5, %v716_v23  ;;  %v471_v33 = vand.u32 2147483647, %v716_v23 }
 0x115   : > { %721 = vpow2.f32 %v463_v24 }
 0x116   : > { %723 = vlog2.f32 %v465_v25  ;;  %v469_v30 = vadd.f32 1.0, %v468_v28  ;;  %vm472_vm8 = vcmp.lt.f32.partialorder %v471_v33, 0.0004427343 }
 0x117   : > { %v718_v26 = vpop.eup %717 }
 0x118   : > { %v474_v27 = vadd.f32 1.0, %v718_v26  ;;  %v477_v31 = vmul.f32 -0.5, %v718_v26  ;;  %v470_v39 = vmul.f32 %v716_v23, %v469_v30  ;;  %v480_v41 = vand.u32 2147483647, %v718_v26 }
 0x11a   : > { %725 = vlog2.f32 %v474_v27  ;;  %v478_v40 = vadd.f32 1.0, %v477_v31  ;;  %vm481_vm10 = vcmp.lt.f32.partialorder %v480_v41, 0.0004427343 }
 0x11b   : > { %v720_v29 = vpop.eup %719 }
 0x11c   : > { %v483_v32 = vadd.f32 1.0, %v720_v29  ;;  %v486_v42 = vmul.f32 -0.5, %v720_v29  ;;  %v479_v47 = vmul.f32 %v718_v26, %v478_v40  ;;  %v489_v54 = vand.u32 2147483647, %v720_v29 }
 0x11e   : > { %727 = vlog2.f32 %v483_v32  ;;  %v487_v52 = vadd.f32 1.0, %v486_v42  ;;  %vm490_vm12 = vcmp.lt.f32.partialorder %v489_v54, 0.0004427343 }
 0x11f   : > { %v722_v34 = vpop.eup %721 }
 0x120   : > { %v724_v35 = vpop.eup %723  ;;  %v492_v36 = vadd.f32 1.0, %v722_v34  ;;  %v495_v48 = vmul.f32 -0.5, %v722_v34  ;;  %v488_v60 = vmul.f32 %v720_v29, %v487_v52  ;;  %v498_v62 = vand.u32 2147483647, %v722_v34 }
 0x121   : > { %v467_v38 = vmul.f32 0.6931472, %v724_v35 }
 0x122   : > { %729 = vlog2.f32 %v492_v36  ;;  %v496_v57 = vadd.f32 1.0, %v495_v48  ;;  %vm499_vm14 = vcmp.lt.f32.partialorder %v498_v62, 0.0004427343 }
 0x123   : > { %v473_v43 = vsel %vm472_vm8, %v470_v39, %v467_v38 }
 0x124   : > { %v726_v44 = vpop.eup %725  ;;  %v501_v45 = vadd.f32 %v473_v43, %v437_v37  ;;  %v497_v3 = vmul.f32 %v722_v34, %v496_v57 }
 0x125   : > { %v476_v46 = vmul.f32 0.6931472, %v726_v44 }
 0x126   : > { %v505_v49 = vsel %vm441_vm9, %v845_v51, %v501_v45  ;;  %v439_v51 = vmax.f32 %v851_v10, 0.0 }
 0x127   : > { %v482_v53 = vsel %vm481_vm10, %v479_v47, %v476_v46  ;;  %731 = vlog2.f32 %v505_v49 }
 0x128   : > { %v502_v55 = vadd.f32 %v482_v53, %v438_v50  ;;  %v728_v56 = vpop.eup %727 }
 0x129   : > { %v485_v59 = vmul.f32 0.6931472, %v728_v56 }
 0x12a   : > { %v506_v58 = vsel %vm442_vm11, %v848_v61, %v502_v55 }
 0x12b   : > { %733 = vlog2.f32 %v506_v58  ;;  %v491_v0 = vsel %vm490_vm12, %v488_v60, %v485_v59 }
 0x12c   : > { %v730_v63 = vpop.eup %729  ;;  %v503_v1 = vadd.f32 %v491_v0, %v439_v51 }
 0x12d   : > { %v494_v2 = vmul.f32 0.6931472, %v730_v63 }
 0x12e   : > { %v507_v61 = vsel %vm443_vm13, %v851_v10, %v503_v1 }
 0x12f   : > { %v500_v5 = vsel %vm499_vm14, %v497_v3, %v494_v2  ;;  %735 = vlog2.f32 %v507_v61 }
 0x130   : > { %v504_v6 = vadd.f32 %v500_v5, %v440_v4 }
 0x131   : > { %v732_v8 = vpop.eup %731 }
 0x132   : > { %v508_v7 = vsel %vm444_vm15, %v856_v17, %v504_v6  ;;  %v510_v11 = vmul.f32 0.6931472, %v732_v8 }
 0x133   : > { %737 = vlog2.f32 %v508_v7 }
 0x135   : > { %v734_v9 = vpop.eup %733 }
 0x136   : > { %v512_v12 = vmul.f32 0.6931472, %v734_v9 }
 0x138   : > { %v517_v13 = vadd.f32 %v512_v12, %v510_v11 }
 0x139   : > { %v736_v14 = vpop.eup %735 }
 0x13a   : > { %v514_v16 = vmul.f32 0.6931472, %v736_v14 }
 0x13c   : > { %v518_v19 = vadd.f32 %v517_v13, %v514_v16 }
 0x13d   : > { %v738_v18 = vpop.eup %737 }
 0x13e   : > { %v516_v10 = vmul.f32 0.6931472, %v738_v18 }
 0x140   : > { %v519_v20 = vadd.f32 %v518_v19, %v516_v10 }
 0x142   : > { %v520_v21 = vrot.slane %v519_v20, 4 }
 0x144   : > { %v521_v22 = vadd.f32 %v520_v21, %v519_v20 }
 0x146   : > { %v522_v23 = vrot.slane %v521_v22, 2 }
 0x148   : > { %v523_v24 = vadd.f32 %v522_v23, %v521_v22 }
 0x14a   : > { %v524_v25 = vrot.slane %v523_v24, 1 }
 0x14c   : > { %v525_v26 = vadd.f32 %v524_v25, %v523_v24 }
 0x14e   : > { %v526_v17 = vmax.f32 %v525_v26, -23.02585 }
 0x150   : > { %v527_v27 = vmin.f32 %v526_v17, 9.2103405 }
 0x152   : > { %v528_v28 = vsub.f32 %v527_v27, %v854_v15 }
 0x154   : > { %v529_v29 = vmul.f32 1.442695, %v528_v28 }
 0x156   : > { %739 = vpow2.f32 %v529_v29 }
 0x160   : > { %v740_v30 = vpop.eup %739 }
 0x161   : > { %531 = vst [vmem:[%s136_s7] sm:$0x1] %v740_v30 }
 0x162 PF: > { %s12_s9 = sadd.s32 1, %s747_s9  }
 0x163   : > { %p9_p4 = scmp.ge.s32.totalorder %s12_s9, 4  }
 0x165   :  { %11 = sbr.rel (!%p9_p4) target bundleno = 1 (0x1), region = 58 }

</bundles_post_ra>
